<compile_context>
chip_gen: v7x
topology: tpu7x:2x2x1
jax: 0.10.0
libtpu: 0.0.40
codegen_flags: <defaults>
</compile_context>

<pallas_src>
import functools

import jax
import jax.numpy as jnp
from jax import lax
from jax.experimental import pallas as pl
from jax.experimental.pallas import tpu as pltpu


def residual_attention_kernel(x_ref, wqkv_ref, wout_ref, bout_ref, out_ref,
                              *, n_valid, tq):
    # x_ref   : (1, C, NP)     one batch element, channels-first, padded tokens
    # wqkv_ref: (3, 1, Dh, C)  this head's q/k/v 1x1-conv weights (scale folded into q)
    # wout_ref: (1, C, Dh)     this head's slice of the output 1x1-conv weight
    # bout_ref: (C, 1)         output 1x1-conv bias
    # out_ref : (1, C, TQ)     this query tile of attention(x) + x (accumulated over heads)
    np_tok = x_ref.shape[2]
    head = pl.program_id(2)

    q_off = pl.multiple_of(pl.program_id(1) * tq, tq)
    x_all = x_ref[0]                                    # (C, NP)  f32
    x_q = x_ref[0, :, pl.ds(q_off, tq)]                 # (C, TQ)  f32

    wq = wqkv_ref[0, 0]                                 # (Dh, C)  (scale folded in)
    wk = wqkv_ref[1, 0]                                 # (Dh, C)
    wv = wqkv_ref[2, 0]                                 # (Dh, C)

    # --- 1x1-conv q/k/v projection for this head (depth-C matmuls; the MXU is
    #     otherwise idle in this phase, so this is effectively free). ---
    cdims = (((1,), (0,)), ((), ()))
    q = lax.dot_general(wq, x_q, cdims, preferred_element_type=jnp.float32)    # (Dh, TQ)
    k = lax.dot_general(wk, x_all, cdims, preferred_element_type=jnp.float32)  # (Dh, NP)
    v = lax.dot_general(wv, x_all, cdims, preferred_element_type=jnp.float32)  # (Dh, NP)

    # --- logits: sim[i, j] = sum_d q[d, i] * k[d, j]  (bf16 MXU, f32 acc) ---
    sim = lax.dot_general(q.astype(jnp.bfloat16), k.astype(jnp.bfloat16),
                          (((0,), (0,)), ((), ())),
                          preferred_element_type=jnp.float32)                  # (TQ, NP)

    if n_valid < np_tok:  # static: mask padded key tokens out of the softmax
        key_ids = lax.broadcasted_iota(jnp.int32, sim.shape, 1)
        sim = jnp.where(key_ids < n_valid, sim, -1e30)

    # --- un-normalized softmax in f32 (safe on v5e's non-bf16 VPU/EUP);
    #     normalization is deferred past the PV matmul. ---
    m = jnp.max(sim, axis=-1, keepdims=True)            # (TQ, 1)
    p = jnp.exp(sim - m)                                 # (TQ, NP) f32
    row_sum = jnp.sum(p, axis=-1, keepdims=True)         # (TQ, 1)

    # --- PV with un-normalized p (bf16 MXU, f32 acc); queries land on the
    #     sublane axis so the (TQ, 1) reciprocal broadcasts with no relayout ---
    pv = lax.dot_general(p.astype(jnp.bfloat16), v.astype(jnp.bfloat16),
                         (((1,), (1,)), ((), ())),
                         preferred_element_type=jnp.float32)                   # (TQ, Dh)
    out_h = pv * pl.reciprocal(row_sum, approx=True)                           # (TQ, Dh)

    # --- this head's slice of the output 1x1 conv: y = wout_h @ out_h^T ---
    y = lax.dot_general(wout_ref[0].astype(jnp.bfloat16),
                        out_h.astype(jnp.bfloat16),
                        (((1,), (1,)), ((), ())),
                        preferred_element_type=jnp.float32)                    # (C, TQ)

    # --- residual + bias on the first head, then accumulate heads ---
    @pl.when(head == 0)
    def _():
        out_ref[0] = x_q + bout_ref[...]

    out_ref[0] += y


def _vmem_limit_bytes(c, np_tok, tq, dh):
    f32, bf16 = 4, 2
    blocks = 2 * c * np_tok * f32                 # x block (double-buffered)
    blocks += 2 * c * tq * f32                    # out block
    weights = 4 * (3 * dh * c + c * dh + c) * f32
    inter = 2 * tq * np_tok * f32                 # sim + p (f32)
    inter += tq * np_tok * bf16                   # p bf16 copy
    inter += (dh * tq + 2 * dh * np_tok) * (f32 + bf16)   # q/k/v (+ bf16 copies)
    inter += (tq * dh + 2 * c * tq) * f32         # pv / out_h / y temporaries
    est = blocks + weights + inter
    return int(min(64 * 1024 * 1024, max(8 * 1024 * 1024, 2 * est)))


def residual_attention_pallas(x_ncdhw, wqkv, wout, bout, *, heads, dim_head, tq=128):
    """x_ncdhw: (b, c, z, phi, r) f32.  wqkv: (3*hidden, c), wout: (c, hidden),
    bout: (c,) — natural Conv3d 1x1 (out_ch, in_ch) weight layouts.
    Returns attention(x) + x with the same NCDHW shape."""
    b, c, zz, pp, rr = x_ncdhw.shape
    n_tok = zz * pp * rr
    hidden = heads * dim_head
    scale = float(dim_head) ** (-0.5)

    # Pad the token axis to a multiple of 128 so it is lane-dense everywhere.
    np_tok = ((n_tok + 127) // 128) * 128
    x_t = x_ncdhw.reshape(b, c, n_tok)
    if np_tok != n_tok:
        x_t = jnp.pad(x_t, ((0, 0), (0, 0), (0, np_tok - n_tok)))

    tq = min(tq, np_tok)
    assert np_tok % tq == 0
    n_q = np_tok // tq

    # Fold the 1/sqrt(Dh) scale into the q rows (weight-side, tiny) and reshape
    # so BlockSpecs hand the kernel exactly one head's weight slice per step.
    wqkv_s = wqkv.at[:hidden].multiply(scale)
    wqkv_r = wqkv_s.reshape(3, heads, dim_head, c)                  # (3, H, Dh, C)
    wout_r = wout.reshape(c, heads, dim_head).transpose(1, 0, 2)    # (H, C, Dh)
    bout2d = bout.reshape(c, 1)

    kernel = functools.partial(residual_attention_kernel, n_valid=n_tok, tq=tq)

    out_t = pl.pallas_call(
        kernel,
        out_shape=jax.ShapeDtypeStruct((b, c, np_tok), jnp.float32),
        grid_spec=pltpu.PrefetchScalarGridSpec(
            num_scalar_prefetch=0,
            grid=(b, n_q, heads),
            in_specs=[
                pl.BlockSpec((1, c, np_tok), lambda i, j, h: (i, 0, 0)),
                pl.BlockSpec((3, 1, dim_head, c), lambda i, j, h: (0, h, 0, 0)),
                pl.BlockSpec((1, c, dim_head), lambda i, j, h: (h, 0, 0)),
                pl.BlockSpec((c, 1), lambda i, j, h: (0, 0)),
            ],
            out_specs=pl.BlockSpec((1, c, tq), lambda i, j, h: (i, 0, j)),
        ),
        compiler_params=pltpu.CompilerParams(
            dimension_semantics=("parallel", "parallel", "arbitrary"),
            vmem_limit_bytes=_vmem_limit_bytes(c, np_tok, tq, dim_head)),
    )(x_t, wqkv_r, wout_r, bout2d)

    # Drop the token padding and restore NCDHW (pure reshape).
    return out_t[:, :, :n_tok].reshape(b, c, zz, pp, rr)


def residual_attention_reference(x_ncdhw, wqkv, wout, bout, *, heads, dim_head):
    """Pure-JAX f32 reference mirroring Residual(Attention) in PyTorch."""
    b, c, zz, pp, rr = x_ncdhw.shape
    n = zz * pp * rr
    hidden = heads * dim_head
    scale = float(dim_head) ** (-0.5)

    x_t = x_ncdhw.reshape(b, c, n)
    qkv = jnp.einsum('oc,bcn->bon', wqkv, x_t)          # (b, 3*hidden, N)
    q, k, v = jnp.split(qkv, 3, axis=1)
    q = q.reshape(b, heads, dim_head, n) * scale
    k = k.reshape(b, heads, dim_head, n)
    v = v.reshape(b, heads, dim_head, n)
    sim = jnp.einsum('bhdi,bhdj->bhij', q, k)
    sim = sim - jnp.max(sim, axis=-1, keepdims=True)
    attn = jax.nn.softmax(sim, axis=-1)
    out = jnp.einsum('bhij,bhdj->bhdi', attn, v)        # (b, H, Dh, N)
    out = out.reshape(b, hidden, n)
    y = jnp.einsum('ch,bhn->bcn', wout, out) + bout[None, :, None]
    y = y + x_t                                         # residual: fn(x) + x
    return y.reshape(b, c, zz, pp, rr)


if __name__ == "__main__":
    # Small shapes consistent with the module: dim=4 channels, heads=4,
    # dim_head=32, spatial (z, phi, r) = (4, 4, 4) -> 64 tokens, batch=2.
    dim = 4
    heads = 4
    dim_head = 32
    hidden = heads * dim_head
    b, zz, pp, rr = 2, 4, 4, 4

    key = jax.random.PRNGKey(0)
    kx, kq, kw, kb = jax.random.split(key, 4)

    x = jax.random.normal(kx, (b, dim, zz, pp, rr), dtype=jnp.float32)
    # Conv3d(dim, 3*hidden, 1, bias=False) weight (out,in,1,1,1) -> (out, in)
    wqkv = jax.random.normal(kq, (3 * hidden, dim), dtype=jnp.float32) * 0.05
    # Conv3d(hidden, dim, 1) weight + bias
    wout = jax.random.normal(kw, (dim, hidden), dtype=jnp.float32) * 0.05
    bout = jax.random.normal(kb, (dim,), dtype=jnp.float32) * 0.01

    out = residual_attention_pallas(x, wqkv, wout, bout,
                                    heads=heads, dim_head=dim_head)
    out = jax.block_until_ready(out)

    ref = residual_attention_reference(x, wqkv, wout, bout,
                                       heads=heads, dim_head=dim_head)
    assert out.shape == (b, dim, zz, pp, rr)
    # bf16 MXU operands + EUP approx reciprocal vs f32 reference: ~1e-3 level.
    assert jnp.allclose(out, ref, atol=1e-2, rtol=1e-2), "mismatch vs reference"

    print("KERNEL_OK")
</pallas_src>

<mosaic_0001>
module attributes {stable_mosaic.version = 11 : i64} {
  func.func @residual_attention_kernel(%arg0: i32, %arg1: i32, %arg2: i32, %arg3: memref<1x4x128xf32, #tpu.memory_space<vmem>>, %arg4: memref<3x1x32x4xf32, #tpu.memory_space<vmem>>, %arg5: memref<1x4x32xf32, #tpu.memory_space<vmem>>, %arg6: memref<4x1xf32, #tpu.memory_space<vmem>>, %arg7: memref<1x4x128xf32, #tpu.memory_space<vmem>>) attributes {dimension_semantics = [#tpu.dimension_semantics<parallel>, #tpu.dimension_semantics<parallel>, #tpu.dimension_semantics<arbitrary>], iteration_bounds = array<i64: 2, 1, 4>, scalar_prefetch = 0 : i64, scratch_operands = 0 : i64, tpu.core_type = #tpu.core_type<tc>, window_params = [{transform_indices = @transform_0, window_bounds = array<i64: 1, 4, 128>}, {transform_indices = @transform_1, window_bounds = array<i64: 3, 1, 32, 4>}, {transform_indices = @transform_2, window_bounds = array<i64: 1, 4, 32>}, {pipeline_mode = #tpu.pipeline_mode<synchronous>, transform_indices = @transform_3, window_bounds = array<i64: 4, 1>}, {transform_indices = @transform_4, window_bounds = array<i64: 1, 4, 128>}]} {
    %c128_i32 = arith.constant 128 : i32
    %0 = arith.muli %arg1, %c128_i32 : i32
    %1 = tpu.assume_multiple %0, 128 : i32
    %c0 = arith.constant 0 : index
    %c0_0 = arith.constant 0 : index
    %c0_1 = arith.constant 0 : index
    %2 = vector.load %arg3[%c0, %c0_0, %c0_1] : memref<1x4x128xf32, #tpu.memory_space<vmem>>, vector<1x4x128xf32>
    %3 = vector.shape_cast %2 : vector<1x4x128xf32> to vector<4x128xf32>
    %c0_2 = arith.constant 0 : index
    %c0_3 = arith.constant 0 : index
    %4 = arith.index_cast %1 : i32 to index
    %5 = vector.load %arg3[%c0_2, %c0_3, %4] : memref<1x4x128xf32, #tpu.memory_space<vmem>>, vector<1x4x128xf32>
    %6 = vector.shape_cast %5 : vector<1x4x128xf32> to vector<4x128xf32>
    %c0_4 = arith.constant 0 : index
    %c0_5 = arith.constant 0 : index
    %c0_6 = arith.constant 0 : index
    %c0_7 = arith.constant 0 : index
    %7 = vector.load %arg4[%c0_4, %c0_5, %c0_6, %c0_7] : memref<3x1x32x4xf32, #tpu.memory_space<vmem>>, vector<1x1x32x4xf32>
    %8 = vector.shape_cast %7 : vector<1x1x32x4xf32> to vector<32x4xf32>
    %c1 = arith.constant 1 : index
    %c0_8 = arith.constant 0 : index
    %c0_9 = arith.constant 0 : index
    %c0_10 = arith.constant 0 : index
    %9 = vector.load %arg4[%c1, %c0_8, %c0_9, %c0_10] : memref<3x1x32x4xf32, #tpu.memory_space<vmem>>, vector<1x1x32x4xf32>
    %10 = vector.shape_cast %9 : vector<1x1x32x4xf32> to vector<32x4xf32>
    %c2 = arith.constant 2 : index
    %c0_11 = arith.constant 0 : index
    %c0_12 = arith.constant 0 : index
    %c0_13 = arith.constant 0 : index
    %11 = vector.load %arg4[%c2, %c0_11, %c0_12, %c0_13] : memref<3x1x32x4xf32, #tpu.memory_space<vmem>>, vector<1x1x32x4xf32>
    %12 = vector.shape_cast %11 : vector<1x1x32x4xf32> to vector<32x4xf32>
    %cst = arith.constant dense<0.000000e+00> : vector<32x128xf32>
    %13 = tpu.matmul %8, %6, %cst {dimension_numbers = #tpu.dot_dimension_numbers<[1], [0], [0], [1], [0, 0, 1, 1], [], []>} : vector<32x4xf32>, vector<4x128xf32>, vector<32x128xf32> -> vector<32x128xf32>
    %cst_14 = arith.constant dense<0.000000e+00> : vector<32x128xf32>
    %14 = tpu.matmul %10, %3, %cst_14 {dimension_numbers = #tpu.dot_dimension_numbers<[1], [0], [0], [1], [0, 0, 1, 1], [], []>} : vector<32x4xf32>, vector<4x128xf32>, vector<32x128xf32> -> vector<32x128xf32>
    %cst_15 = arith.constant dense<0.000000e+00> : vector<32x128xf32>
    %15 = tpu.matmul %12, %3, %cst_15 {dimension_numbers = #tpu.dot_dimension_numbers<[1], [0], [0], [1], [0, 0, 1, 1], [], []>} : vector<32x4xf32>, vector<4x128xf32>, vector<32x128xf32> -> vector<32x128xf32>
    %16 = arith.truncf %13 : vector<32x128xf32> to vector<32x128xbf16>
    %17 = arith.truncf %14 : vector<32x128xf32> to vector<32x128xbf16>
    %cst_16 = arith.constant dense<0.000000e+00> : vector<128x128xf32>
    %18 = tpu.matmul %16, %17, %cst_16 {dimension_numbers = #tpu.dot_dimension_numbers<[0], [0], [1], [1], [0, 1, 1, 1], [], []>} : vector<32x128xbf16>, vector<32x128xbf16>, vector<128x128xf32> -> vector<128x128xf32>
    %19 = tpu.iota {dimensions = array<i32: 1>} : vector<128x128xi32>
    %c64_i32 = arith.constant 64 : i32
    %20 = vector.broadcast %c64_i32 : i32 to vector<128x128xi32>
    %21 = arith.cmpi slt, %19, %20 : vector<128x128xi32>
    %cst_17 = arith.constant -1.000000e+30 : f32
    %22 = vector.broadcast %cst_17 : f32 to vector<128x128xf32>
    %23 = arith.select %21, %18, %22 : vector<128x128xi1>, vector<128x128xf32>
    %cst_18 = arith.constant dense<0xFF800000> : vector<128xf32>
    %24 = vector.multi_reduction <maximumf>, %23, %cst_18 [1] : vector<128x128xf32> to vector<128xf32>
    %25 = vector.shape_cast %24 : vector<128xf32> to vector<128x1xf32>
    %26 = vector.broadcast %25 : vector<128x1xf32> to vector<128x128xf32>
    %27 = arith.subf %23, %26 : vector<128x128xf32>
    %28 = math.exp %27 : vector<128x128xf32>
    %cst_19 = arith.constant dense<0.000000e+00> : vector<128xf32>
    %29 = vector.multi_reduction <add>, %28, %cst_19 [1] : vector<128x128xf32> to vector<128xf32>
    %30 = vector.shape_cast %29 : vector<128xf32> to vector<128x1xf32>
    %31 = arith.truncf %28 : vector<128x128xf32> to vector<128x128xbf16>
    %32 = arith.truncf %15 : vector<32x128xf32> to vector<32x128xbf16>
    %cst_20 = arith.constant dense<0.000000e+00> : vector<128x32xf32>
    %33 = tpu.matmul %31, %32, %cst_20 {dimension_numbers = #tpu.dot_dimension_numbers<[1], [1], [0], [0], [0, 0, 1, 0], [], []>} : vector<128x128xbf16>, vector<32x128xbf16>, vector<128x32xf32> -> vector<128x32xf32>
    %34 = tpu.reciprocal %30 {approx = true} : vector<128x1xf32> -> vector<128x1xf32>
    %35 = vector.broadcast %34 : vector<128x1xf32> to vector<128x32xf32>
    %36 = arith.mulf %33, %35 : vector<128x32xf32>
    %c0_21 = arith.constant 0 : index
    %c0_22 = arith.constant 0 : index
    %c0_23 = arith.constant 0 : index
    %37 = vector.load %arg5[%c0_21, %c0_22, %c0_23] : memref<1x4x32xf32, #tpu.memory_space<vmem>>, vector<1x4x32xf32>
    %38 = vector.shape_cast %37 : vector<1x4x32xf32> to vector<4x32xf32>
    %39 = arith.truncf %38 : vector<4x32xf32> to vector<4x32xbf16>
    %40 = arith.truncf %36 : vector<128x32xf32> to vector<128x32xbf16>
    %cst_24 = arith.constant dense<0.000000e+00> : vector<4x128xf32>
    %41 = tpu.matmul %39, %40, %cst_24 {dimension_numbers = #tpu.dot_dimension_numbers<[1], [1], [0], [0], [0, 0, 1, 0], [], []>} : vector<4x32xbf16>, vector<128x32xbf16>, vector<4x128xf32> -> vector<4x128xf32>
    %c0_i32 = arith.constant 0 : i32
    %42 = arith.cmpi eq, %arg2, %c0_i32 : i32
    %43 = arith.extui %42 : i1 to i32
    %c0_i32_25 = arith.constant 0 : i32
    %44 = arith.cmpi ne, %43, %c0_i32_25 : i32
    scf.if %44 {
      %c0_32 = arith.constant 0 : index
      %c0_33 = arith.constant 0 : index
      %51 = vector.load %arg6[%c0_32, %c0_33] : memref<4x1xf32, #tpu.memory_space<vmem>>, vector<4x1xf32>
      %52 = vector.broadcast %51 : vector<4x1xf32> to vector<4x128xf32>
      %53 = arith.addf %6, %52 : vector<4x128xf32>
      %c0_34 = arith.constant 0 : index
      %c0_35 = arith.constant 0 : index
      %c0_36 = arith.constant 0 : index
      %54 = vector.load %arg7[%c0_34, %c0_35, %c0_36] : memref<1x4x128xf32, #tpu.memory_space<vmem>>, vector<1x4x128xf32>
      %55 = vector.shape_cast %54 : vector<1x4x128xf32> to vector<4x128xf32>
      %56 = vector.shape_cast %53 : vector<4x128xf32> to vector<1x4x128xf32>
      tpu.vector_store %arg7[%c0_34, %c0_35, %c0_36], %56 {strides = array<i32>} : memref<1x4x128xf32, #tpu.memory_space<vmem>>, vector<1x4x128xf32>,
    } else {
    }
    %c0_26 = arith.constant 0 : index
    %c0_27 = arith.constant 0 : index
    %c0_28 = arith.constant 0 : index
    %45 = vector.load %arg7[%c0_26, %c0_27, %c0_28] : memref<1x4x128xf32, #tpu.memory_space<vmem>>, vector<1x4x128xf32>
    %46 = vector.shape_cast %45 : vector<1x4x128xf32> to vector<4x128xf32>
    %47 = arith.addf %46, %41 : vector<4x128xf32>
    %c0_29 = arith.constant 0 : index
    %c0_30 = arith.constant 0 : index
    %c0_31 = arith.constant 0 : index
    %48 = vector.load %arg7[%c0_29, %c0_30, %c0_31] : memref<1x4x128xf32, #tpu.memory_space<vmem>>, vector<1x4x128xf32>
    %49 = vector.shape_cast %48 : vector<1x4x128xf32> to vector<4x128xf32>
    %50 = vector.shape_cast %47 : vector<4x128xf32> to vector<1x4x128xf32>
    tpu.vector_store %arg7[%c0_29, %c0_30, %c0_31], %50 {strides = array<i32>} : memref<1x4x128xf32, #tpu.memory_space<vmem>>, vector<1x4x128xf32>,
    return
  }
  func.func @transform_0(%arg0: i32, %arg1: i32, %arg2: i32) -> (i32, i32, i32) {
    %c0_i32 = arith.constant 0 : i32
    %c0_i32_0 = arith.constant 0 : i32
    %c0_i32_1 = arith.constant 0 : i32
    return %arg0, %c0_i32, %c0_i32_0 : i32, i32, i32
  }
  func.func @transform_1(%arg0: i32, %arg1: i32, %arg2: i32) -> (i32, i32, i32, i32) {
    %c0_i32 = arith.constant 0 : i32
    %c0_i32_0 = arith.constant 0 : i32
    %c0_i32_1 = arith.constant 0 : i32
    %c0_i32_2 = arith.constant 0 : i32
    return %c0_i32, %arg2, %c0_i32_0, %c0_i32_1 : i32, i32, i32, i32
  }
  func.func @transform_2(%arg0: i32, %arg1: i32, %arg2: i32) -> (i32, i32, i32) {
    %c0_i32 = arith.constant 0 : i32
    %c0_i32_0 = arith.constant 0 : i32
    %c0_i32_1 = arith.constant 0 : i32
    return %arg2, %c0_i32, %c0_i32_0 : i32, i32, i32
  }
  func.func @transform_3(%arg0: i32, %arg1: i32, %arg2: i32) -> (i32, i32) {
    %c0_i32 = arith.constant 0 : i32
    %c0_i32_0 = arith.constant 0 : i32
    %c0_i32_1 = arith.constant 0 : i32
    return %c0_i32, %c0_i32_0 : i32, i32
  }
  func.func @transform_4(%arg0: i32, %arg1: i32, %arg2: i32) -> (i32, i32, i32) {
    %c0_i32 = arith.constant 0 : i32
    %c0_i32_0 = arith.constant 0 : i32
    return %arg0, %c0_i32, %arg1 : i32, i32, i32
  }
}

</mosaic_0001>

<bundles_post_ra>
// kernel: tpu_custom_call.1
= control target key start
LH: loop header
LB: loop body
LE: loop exit
PB: predicated region body
PF: predicated region fallthrough
CT: control target
= control target key end

     0   :  { %9 = vsyncpa [#allocation4], 0  ;;  %s2058_s0 = inlined_call_operand.vmem [shape: f32[2,4,128], index: 0, kind: input, shape index: {}]   ;;  %s2059_s1 = inlined_call_operand.vmem [shape: f32[3,4,32,4], index: 1, kind: input, shape index: {}]   ;;  %s2060_s2 = inlined_call_operand.vmem [shape: f32[4,4,32], index: 2, kind: input, shape index: {}]   ;;  %s2061_s3 = inlined_call_operand.vmem [shape: f32[4,1], index: 3, kind: input, shape index: {}]   ;;  %s2062_s4 = inlined_call_operand.hbm [shape: f32[2,4,128], index: 4, kind: output, shape index: {}]  }
   0x1   :  { %11 = vsyncpa [#allocation4 + $0x1], 0  ;;  %s1749_s15 = smov 0   ;;  %s1751_s16 = smov 0  }
   0x2   :  { %s1753_s17 = smov 0   ;;  %s1755_s18 = smov 0  }
   0x3   :  { %s1757_s19 = smov 0   ;;  %s1759_s20 = smov 0  }
   0x4   :  { %s1761_s21 = smov 0   ;;  %s1763_s22 = smov 0  }
   0x5   :  { %s1765_s23 = smov 0   ;;  %s1767_s24 = smov 0  }
   0x6 LB: > { %s1274_s25 = sadd.s32 4294967295, %s1718_s24   ;;  %s1275_s26 = sadd.s32 4294967294, %s1718_s24   ;;  %s1718_s24 = sphi %s1767_s24, %s17_s24   ;;  %s1714_s23 = sphi %s1765_s23, %s2074_s23   ;;  %s1710_s22 = sphi %s1763_s22, %s2073_s22   ;;  %s1706_s21 = sphi %s1761_s21, %s2072_s21   ;;  %s1702_s20 = sphi %s1759_s20, %s2071_s20   ;;  %s1698_s19 = sphi %s1757_s19, %s2070_s19   ;;  %s1694_s18 = sphi %s1755_s18, %s2069_s18   ;;  %s1690_s17 = sphi %s1753_s17, %s2068_s17   ;;  %s1686_s16 = sphi %s1751_s16, %s2067_s16   ;;  %s1682_s15 = sphi %s1749_s15, %s2066_s15  }
   0x7   : > { %s29_s27 = sadd.s32 1, %s1710_s22  ;;  %s36_s28 = sadd.s32 1, %s1714_s23 }
   0x8   : > { %p30_p0 = scmp.ge.s32.totalorder %s29_s27, 4  ;;  %s69_s29 = sadd.s32 1, %s1698_s19 }
   0x9   : > { %p76_p1 = scmp.ne.s32.totalorder %s1698_s19, %s1694_s18  ;;  %p77_p2 = scmp.eq.s32.totalorder %s1718_s24, 0 }
   0xa   : > { %s2076_s27 = smov (%p30_p0, %s29_s27), 0  ;;  %s2078_s28 = smov (!%p30_p0, %s36_s28), %s1714_s23 }
   0xb   : > { %s66_s30 = ssub.s32 %s1710_s22, %s2076_s27  ;;  %p1812_p3 = por %p77_p2, %p76_p1 }
   0xc   : > { %p38_p4 = scmp.ge.s32.totalorder %s2078_s28, 2  ;;  %p67_p5 = scmp.eq.s32.totalorder %s66_s30, 0 }
   0xd   : > { %s144_s6 = sadd.s32 1, %s1690_s17  ;;  %p154_p6 = scmp.ne.s32.totalorder %s1690_s17, %s1686_s16 }
   0xe   : > { %s2080_s28 = smov (%p38_p4, %s2078_s28), 0  ;;  %p155_p7 = scmp.eq.s32.totalorder %s1274_s25, 7 }
   0xf   : > { %s1822_s7 = scalar_select %p67_p5, %s1698_s19, %s69_s29  }
  0x10   : > { %s139_s8 = ssub.s32 %s1714_s23, %s2080_s28  ;;  %p160_p9 = scmp.ne.s32.totalorder %s1686_s16, %s1682_s15 }
  0x11   : > { %p142_p8 = scmp.eq.s32.totalorder %s139_s8, 0  ;;  %p1828_p10 = por %p155_p7, %p154_p6 }
  0x12   : > { %p161_p11 = scmp.eq.s32.totalorder %s1275_s26, 7  ;;  %p1277_p13 = scmp.ge.s32.totalorder %s1718_s24, 8 }
  0x13   : > { %s1833_s10 = scalar_select %p142_p8, %s1690_s17, %s144_s6  }
  0x14   : > { %p1835_p12 = por %p161_p11, %p160_p9  ;;  %180 = sbr.rel (%p1277_p13) target bundleno = 38 (0x26), region = 20 }
  0x1b   : > { %190 = sbr.rel (!%p1812_p3) target bundleno = 38 (0x26), region = 28  ;;  %s192_s12 = sand.u32 (%p1812_p3), 1, %s1698_s19  }
  0x1c   : > { %s1321_s13 = sshll.u32 (%p1812_p3), %s1710_s22, 5  ;;  %s1450_s14 = smul.u32 (%p1812_p3), 96, %s192_s12 }
  0x1d   : > { %s197_s26 = scalar_lea.vmem (%p1812_p3), %s2059_s1, %s1321_s13 }
  0x1e   : > { %v247_v0 = vld [vmem:[%s197_s26] sm:$0xff] (%p1812_p3)  ;;  %v249_v1 = vld [vmem:[%s197_s26 + $0x8] sm:$0xff] (%p1812_p3)  ;;  %v251_v2 = vld [vmem:[%s197_s26 + $0x10] sm:$0xff] (%p1812_p3)  ;;  %s194_s30 = scalar_lea.vmem (%p1812_p3), [#allocation2], %s1450_s14 }
  0x1f   : > { %v253_v3 = vld [vmem:[%s197_s26 + $0x18] sm:$0xff] (%p1812_p3)  ;;  %v255_v4 = vld [vmem:[%s197_s26 + $0x80] sm:$0xff] (%p1812_p3)  ;;  %v257_v5 = vld [vmem:[%s197_s26 + $0x88] sm:$0xff] (%p1812_p3)  ;;  %248 = vst [vmem:[%s194_s30] sm:$0xff] (%p1812_p3), %v247_v0 }
  0x20   : > { %250 = vst [vmem:[%s194_s30 + $0x8] sm:$0xff] (%p1812_p3), %v249_v1  ;;  %252 = vst [vmem:[%s194_s30 + $0x10] sm:$0xff] (%p1812_p3), %v251_v2  ;;  %v259_v6 = vld [vmem:[%s197_s26 + $0x90] sm:$0xff] (%p1812_p3)  ;;  %v261_v7 = vld [vmem:[%s197_s26 + $0x98] sm:$0xff] (%p1812_p3) }
  0x21   : > { %254 = vst [vmem:[%s194_s30 + $0x18] sm:$0xff] (%p1812_p3), %v253_v3  ;;  %256 = vst [vmem:[%s194_s30 + $0x20] sm:$0xff] (%p1812_p3), %v255_v4  ;;  %v263_v8 = vld [vmem:[%s197_s26 + $0x100] sm:$0xff] (%p1812_p3)  ;;  %v265_v9 = vld [vmem:[%s197_s26 + $0x108] sm:$0xff] (%p1812_p3) }
  0x22   : > { %258 = vst [vmem:[%s194_s30 + $0x28] sm:$0xff] %v257_v5  ;;  %260 = vst [vmem:[%s194_s30 + $0x30] sm:$0xff] %v259_v6  ;;  %v267_v10 = vld [vmem:[%s197_s26 + $0x110] sm:$0xff]  ;;  %v269_v11 = vld [vmem:[%s197_s26 + $0x118] sm:$0xff] }
  0x23   : > { %262 = vst [vmem:[%s194_s30 + $0x38] sm:$0xff] %v261_v7  ;;  %264 = vst [vmem:[%s194_s30 + $0x40] sm:$0xff] %v263_v8 }
  0x24   : > { %266 = vst [vmem:[%s194_s30 + $0x48] sm:$0xff] %v265_v9  ;;  %268 = vst [vmem:[%s194_s30 + $0x50] sm:$0xff] %v267_v10 }
  0x25   : > { %270 = vst [vmem:[%s194_s30 + $0x58] sm:$0xff] %v269_v11 }
  0x26 PF: > { %p1280_p0 = scmp.ge.s32.totalorder %s1718_s24, 1  ;;  %p282_p1 = scmp.lt.s32.totalorder %s1718_s24, 9 }
  0x28   : > { %p283_p2 = pnand %p1280_p0, %p282_p1 }
  0x29   : > { %s319_s5 = sand.u32 (!%p283_p2), 1, %s1686_s16   ;;  %p322_p3 = scmp.lt.s32.totalorder (!%p283_p2), %s1706_s21, 1  ;;  %vm351_vm0 = vcmask (!%p283_p2), 31744   ;;  %vm364_vm1 = vcmask (!%p283_p2), 1043456   ;;  %vm670_vm2 = vcmask (!%p283_p2), 261120   ;;  %v792_v46 = vlaneseq (!%p283_p2) }
  0x2a   : > { %286 = sbr.rel (%p283_p2) target bundleno = 1282 (0x502), region = 70  ;;  %s1853_s6 = sshll.u32 (!%p283_p2), %s319_s5, 2  ;;  %vm1721_vm4 = vmmov (!%p283_p2), 0  }
  0x2b   : > { %s289_s8 = sand.u32 (!%p283_p2), 1, %s1694_s18   ;;  %v793_v47 = vand.u32 (!%p283_p2), 127, %v792_v46  ;;  %p326_p4 = scmp.lt.s32.totalorder (!%p283_p2), %s1702_s20, 3 }
  0x2c   : > { %s1451_s12 = smul.u32 (!%p283_p2), 96, %s289_s8  ;;  %p1316_p5 = scmp.ne.s32.totalorder (!%p283_p2), %s1702_s20, 0 }
  0x2d   : > { %vm794_vm3 = vcmp.lt.s32.totalorder (!%p283_p2), %v793_v47, 64 }
  0x2e   : > { %s1857_s25 = scalar_lea.vmem (!%p283_p2), [#allocation2], %s1451_s12 }
  0x2f   : > { %v337_v12 = vld [vmem:[%s1857_s25] sm:$0xff] (!%p283_p2)  ;;  %v338_v15 = vld [vmem:[%s1857_s25 + $0x8] sm:$0xff] (!%p283_p2)  ;;  %v339_v16 = vld [vmem:[%s1857_s25 + $0x10] sm:$0xff] (!%p283_p2) }
  0x30   : > { %1368 = vmatprep.mubr.msk.f32.mxu0 (!%p283_p2), %vm351_vm0, %v337_v12  ;;  %v340_v17 = vld [vmem:[%s1857_s25 + $0x18] sm:$0xff] (!%p283_p2)  ;;  %v1284_v18 = vld [vmem:[%s1857_s25 + $0x20] sm:$0xff] (!%p283_p2)  ;;  %v1285_v19 = vld [vmem:[%s1857_s25 + $0x28] sm:$0xff] (!%p283_p2) }
  0x31   : > { %s323_s13 = scalar_select %p322_p3, %s1706_s21, 1  ;;  %v1286_v20 = vld [vmem:[%s1857_s25 + $0x30] sm:$0xff]  ;;  %v1287_v21 = vld [vmem:[%s1857_s25 + $0x38] sm:$0xff]  ;;  %v1288_v28 = vld [vmem:[%s1857_s25 + $0x40] sm:$0xff] }
  0x32   : > { %v1289_v29 = vld [vmem:[%s1857_s25 + $0x48] sm:$0xff]  ;;  %v1290_v30 = vld [vmem:[%s1857_s25 + $0x50] sm:$0xff]  ;;  %v1291_v34 = vld [vmem:[%s1857_s25 + $0x58] sm:$0xff]  ;;  %s327_s18 = scalar_select %p326_p4, %s1702_s20, 3 }
  0x33   : > { %s1282_s14 = sshll.u32 %s323_s13, 2  ;;  %s321_s25 = scalar_lea.vmem [#allocation3], %s1853_s6 }
  0x34   : > { %s325_s30 = scalar_lea.vmem %s2058_s0, %s1282_s14  ;;  %s1283_s8 = sshll.u32 %s327_s18, 2 }
  0x35   : > { %v332_v13 = vld [vmem:[%s325_s30] sm:$0xf]  ;;  %s329_s14 = scalar_lea.vmem %s2060_s2, %s1283_s8 }
  0x36   : > { %v1864_v14 = vld [vmem:[%s325_s30] sm:$0xf] }
  0x37   : > { %1366 = vmatprep.subr.msk.mxu0 %vm364_vm1, %v1864_v14 }
  0x38   : > { %1367 = vmatpush3.msk.msra.mxu0 %vm364_vm1, %v1864_v14 }
  0x39   : > { %1369 = vmatmul.mubr.msk.f32.vlgmr.msra.gmra.mrb[0].mxu0 %vm351_vm0, %v338_v15  ;;  %1374 = vmatprep.subr.msk.mxu0 %vm364_vm1, %v332_v13 }
  0x3a   : > { %1371 = vmatprep.mubr.msk.f32.mxu0 %vm351_vm0, %v339_v16  ;;  %1375 = vmatpush3.msk.msra.mxu0 %vm364_vm1, %v332_v13 }
  0x3b   : > { %1382 = vmatprep.subr.msk.mxu0 %vm364_vm1, %v332_v13 }
  0x3d   : > { %1372 = vmatmul.mubr.msk.f32.gmra.mrb[2].mxu0 %vm351_vm0, %v340_v17 }
  0x3e   : > { %1376 = vmatprep.mubr.msk.f32.mxu0 %vm351_vm0, %v1284_v18 }
  0x41   : > { %1377 = vmatmul.mubr.msk.f32.vlgmr.msra.gmra.mrb[4].mxu0 %vm351_vm0, %v1285_v19 }
  0x42   : > { %1379 = vmatprep.mubr.msk.f32.mxu0 %vm351_vm0, %v1286_v20  ;;  %1383 = vmatpush3.msk.msra.mxu0 %vm364_vm1, %v332_v13 }
  0x45   : > { %1380 = vmatmul.mubr.msk.f32.gmra.mrb[6].mxu0 %vm351_vm0, %v1287_v21 }
  0x46   : > { %1384 = vmatprep.mubr.msk.f32.mxu0 %vm351_vm0, %v1288_v28 }
  0x49   : > { %1385 = vmatmul.mubr.msk.f32.vlgmr.msra.gmra.mrb[8].mxu0 %vm351_vm0, %v1289_v29 }
  0x4a   : > { %1387 = vmatprep.mubr.msk.f32.mxu0 %vm351_vm0, %v1290_v30 }
  0x4d   : > { %1388 = vmatmul.mubr.msk.f32.gmra.mrb[10].mxu0 %vm351_vm0, %v1291_v34 }
 0x10c   : > { %v1370_v22 = vpop.f32.mrb[0].mxu0 }
 0x10d   : > { %v434_v23 = vpop.f32.mrb[1].mxu0 }
 0x10e   : > { %v650_v24 = vpack.c.bf16 %v1370_v22, %v434_v23 }
 0x110   : > { %654 = vxpose.xlu0.c.b16.start [1/2] (short) %v650_v24, 128  ;;  %v1373_v25 = vpop.f32.mrb[2].mxu0 }
 0x111   : > { %v444_v26 = vpop.f32.mrb[3].mxu0 }
 0x112   : > { %v651_v27 = vpack.c.bf16 %v1373_v25, %v444_v26 }
 0x114   : > { %655 = vxpose.xlu0.c.b16.end [2/2] (short) %v651_v27, 128  ;;  %v1378_v31 = vpop.f32.mrb[4].mxu0 }
 0x115   : > { %v534_v32 = vpop.f32.mrb[5].mxu0 }
 0x116   : > { %v652_v33 = vpack.c.bf16 %v1378_v31, %v534_v32 }
 0x118   : > { %v1381_v35 = vpop.f32.mrb[6].mxu0  ;;  %1390 = vmatprep.subr.bf16.mxu1 %v652_v33 }
 0x119   : > { %v544_v36 = vpop.f32.mrb[7].mxu0  ;;  %1391 = vmatpush3.bf16.msra.mxu1 %v652_v33 }
 0x11a   : > { %v653_v37 = vpack.c.bf16 %v1381_v35, %v544_v36 }
 0x11c   : > { %1392 = vmatprep.subr.bf16.mxu1 %v653_v37  ;;  %v1386_v2 = vpop.f32.mrb[8].mxu0 }
 0x11d   : > { %1393 = vmatpush3.bf16.msra.mxu1 %v653_v37  ;;  %v631_v3 = vpop.f32.mrb[9].mxu0 }
 0x11e   : > { %v931_v5 = vpack.c.bf16 %v1386_v2, %v631_v3 }
 0x120   : > { %1410 = vmatprep.subr.bf16.mxu0 %v931_v5  ;;  %v1389_v13 = vpop.f32.mrb[10].mxu0 }
 0x121   : > { %1411 = vmatpush3.bf16.xpose.msra.mxu0 %v931_v5  ;;  %v641_v15 = vpop.f32.mrb[11].mxu0 }
 0x122   : > { %v932_v17 = vpack.c.bf16 %v1389_v13, %v641_v15 }
 0x124   : > { %1412 = vmatprep.subr.bf16.mxu0 %v932_v17 }
 0x129   : > { %1413 = vmatpush3.bf16.xpose.msra.mxu0 %v932_v17 }
 0x176   : > { %v662_v38 = vpop.trf.xlu0 }
 0x177   : > { %1394 = vmatprep.mubr.msk.bf16.mxu1 %vm670_vm2, %v662_v38 }
 0x17a   : > { %v663_v39 = vpop.trf.xlu0 }
 0x17b   : > { %1395 = vmatmul.mubr.msk.bf16.vlgmr.msra.gmra.mrb[0].mxu1 %vm670_vm2, %v663_v39 }
 0x17e   : > { %v664_v40 = vpop.trf.xlu0 }
 0x17f   : > { %1398 = vmatprep.mubr.msk.bf16.mxu1 %vm670_vm2, %v664_v40 }
 0x182   : > { %v665_v41 = vpop.trf.xlu0 }
 0x183   : > { %1399 = vmatmul.mubr.msk.bf16.gmra.mrb[4].mxu1 %vm670_vm2, %v665_v41 }
 0x186   : > { %v666_v42 = vpop.trf.xlu0 }
 0x187   : > { %1402 = vmatprep.mubr.msk.bf16.mxu1 %vm670_vm2, %v666_v42 }
 0x18a   : > { %v667_v43 = vpop.trf.xlu0 }
 0x18b   : > { %1403 = vmatmul.mubr.msk.bf16.gmra.mrb[8].mxu1 %vm670_vm2, %v667_v43 }
 0x18e   : > { %v668_v44 = vpop.trf.xlu0 }
 0x18f   : > { %1406 = vmatprep.mubr.msk.bf16.mxu1 %vm670_vm2, %v668_v44 }
 0x192   : > { %v669_v45 = vpop.trf.xlu0 }
 0x193   : > { %1407 = vmatmul.mubr.msk.bf16.gmra.mrb[12].mxu1 %vm670_vm2, %v669_v45 }
 0x24e   : > { %v1396_v48 = vpop.f32.mrb[0].mxu1 }
 0x24f   : > { %v729_v49 = vpop.f32.mrb[1].mxu1  ;;  %v797_v50 = vsel %vm794_vm3, %v1396_v48, -1e+30 }
 0x250   : > { %815 = vmax.xlane.f32.xlu0 %v797_v50  ;;  %v1397_v51 = vpop.f32.mrb[2].mxu1  ;;  %v795_v52 = vsel %vm794_vm3, %v729_v49, -1e+30 }
 0x251   : > { %811 = vmax.xlane.f32.xlu1 %v795_v52  ;;  %v732_v53 = vpop.f32.mrb[3].mxu1  ;;  %v798_v57 = vsel %vm794_vm3, %v1397_v51, -1e+30 }
 0x252   : > { %v796_v54 = vsel %vm794_vm3, %v732_v53, -1e+30 }
 0x255   : > { %813 = vmax.xlane.f32.xlu1 %v796_v54 }
 0x256   : > { %v1400_v55 = vpop.f32.mrb[4].mxu1 }
 0x257   : > { %v745_v56 = vpop.f32.mrb[5].mxu1  ;;  %v1909_v60 = vsel %vm794_vm3, %v1400_v55, -1e+30 }
 0x258   : > { %v1401_v58 = vpop.f32.mrb[6].mxu1  ;;  %v799_v63 = vsel %vm794_vm3, %v745_v56, -1e+30 }
 0x259   : > { %817 = vmax.xlane.f32.xlu1 %v798_v57  ;;  %v748_v59 = vpop.f32.mrb[7].mxu1  ;;  %v1918_v9 = vsel %vm794_vm3, %v1401_v58, -1e+30 }
 0x25a   : > { %v1914_v4 = vsel %vm794_vm3, %v748_v59, -1e+30 }
 0x25d   : > { %823 = vmax.xlane.f32.xlu1 %v1909_v60 }
 0x25e   : > { %v1404_v61 = vpop.f32.mrb[8].mxu1 }
 0x25f   : > { %v761_v62 = vpop.f32.mrb[9].mxu1  ;;  %v1925_v12 = vsel %vm794_vm3, %v1404_v61, -1e+30 }
 0x260   : > { %v1405_v0 = vpop.f32.mrb[10].mxu1  ;;  %v1934_v18 = vsel %vm794_vm3, %v761_v62, -1e+30 }
 0x261   : > { %819 = vmax.xlane.f32.xlu1 %v799_v63  ;;  %v764_v1 = vpop.f32.mrb[11].mxu1  ;;  %v1942_v20 = vsel %vm794_vm3, %v1405_v0, -1e+30 }
 0x262   : > { %v1938_v19 = vsel %vm794_vm3, %v764_v1, -1e+30 }
 0x265   : > { %821 = vmax.xlane.f32.xlu1 %v1914_v4 }
 0x266   : > { %v1408_v6 = vpop.f32.mrb[12].mxu1 }
 0x267   : > { %v777_v7 = vpop.f32.mrb[13].mxu1  ;;  %v1950_v22 = vsel %vm794_vm3, %v1408_v6, -1e+30 }
 0x268   : > { %v1409_v8 = vpop.f32.mrb[14].mxu1  ;;  %v1946_v21 = vsel %vm794_vm3, %v777_v7, -1e+30 }
 0x269   : > { %825 = vmax.xlane.f32.xlu1 %v1918_v9  ;;  %v780_v10 = vpop.f32.mrb[15].mxu1  ;;  %v1929_v16 = vsel %vm794_vm3, %v1409_v8, -1e+30 }
 0x26a   : > { %v1922_v11 = vsel %vm794_vm3, %v780_v10, -1e+30 }
 0x26b   : > { %837 = vmax.xlane.f32.xlu0 %v1922_v11 }
 0x26d   : > { %831 = vmax.xlane.f32.xlu1 %v1925_v12 }
 0x26f   : > { %841 = vmax.xlane.f32.xlu0 %v1929_v16 }
 0x271   : > { %827 = vmax.xlane.f32.xlu1 %v1934_v18 }
 0x275   : > { %829 = vmax.xlane.f32.xlu1 %v1938_v19 }
 0x279   : > { %833 = vmax.xlane.f32.xlu1 %v1942_v20 }
 0x27d   : > { %835 = vmax.xlane.f32.xlu1 %v1946_v21 }
 0x281   : > { %839 = vmax.xlane.f32.xlu1 %v1950_v22 }
 0x2dd   : > { %v816_v23 = vpop.xlane.xlu0 %815 }
 0x2de   : > { %v845_v24 = vsub.f32 %v797_v50, %v816_v23  ;;  %v812_v25 = vpop.xlane.xlu1 %811 }
 0x2df   : > { %v843_v26 = vsub.f32 %v795_v52, %v812_v25 }
 0x2e0   : > { %v863_v28 = vmul.f32 1.442695, %v845_v24 }
 0x2e1   : > { %v859_v27 = vmul.f32 1.442695, %v843_v26 }
 0x2e2   : > { %v814_v29 = vpop.xlane.xlu1 %813 }
 0x2e3   : > { %1543 = vpow2.f32 %v859_v27  ;;  %v844_v30 = vsub.f32 %v796_v54, %v814_v29 }
 0x2e4   : > { %1545 = vpow2.f32 %v863_v28 }
 0x2e5   : > { %v861_v31 = vmul.f32 1.442695, %v844_v30 }
 0x2e6   : > { %v818_v32 = vpop.xlane.xlu1 %817 }
 0x2e7   : > { %1547 = vpow2.f32 %v861_v31  ;;  %v846_v33 = vsub.f32 %v798_v57, %v818_v32  ;;  %v1720_v32 = vmov 0.0  }
 0x2e8   : > { %1430 = vmatprep.subr.bf16.mxu1 %v1720_v32  ;;  %1446 = vmatprep.mubr.msk.bf16.mxu1 %vm1721_vm4, %v1720_v32 }
 0x2e9   : > { %v865_v34 = vmul.f32 1.442695, %v846_v33 }
 0x2ea   : > { %v824_v35 = vpop.xlane.xlu1 %823 }
 0x2eb   : > { %1549 = vpow2.f32 %v865_v34  ;;  %v849_v37 = vsub.f32 %v1909_v60, %v824_v35 }
 0x2ed   : > { %v1544_v36 = vpop.eup %1543  ;;  %v871_v43 = vmul.f32 1.442695, %v849_v37 }
 0x2ee   : > { %v820_v38 = vpop.xlane.xlu1 %819  ;;  %891 = vadd.xlane.f32.xlu1 %v1544_v36  ;;  %v1546_v40 = vpop.eup %1545 }
 0x2ef   : > { %v847_v39 = vsub.f32 %v799_v63, %v820_v38 }
 0x2f1   : > { %v1548_v41 = vpop.eup %1547  ;;  %v867_v42 = vmul.f32 1.442695, %v847_v39 }
 0x2f2   : > { %v822_v44 = vpop.xlane.xlu1 %821  ;;  %895 = vadd.xlane.f32.xlu1 %v1546_v40  ;;  %893 = vadd.xlane.f32.xlu0 %v1548_v41  ;;  %v923_v45 = vpack.c.bf16 %v1548_v41, %v1544_v36 }
 0x2f3   : > { %1551 = vpow2.f32 %v867_v42  ;;  %v848_v46 = vsub.f32 %v1914_v4, %v822_v44 }
 0x2f4   : > { %1414 = vmatprep.mubr.bf16.mxu0 %v923_v45  ;;  %1553 = vpow2.f32 %v871_v43 }
 0x2f5   : > { %v1550_v47 = vpop.eup %1549  ;;  %v869_v48 = vmul.f32 1.442695, %v848_v46 }
 0x2f6   : > { %v826_v49 = vpop.xlane.xlu1 %825  ;;  %897 = vadd.xlane.f32.xlu0 %v1550_v47  ;;  %v924_v50 = vpack.c.bf16 %v1550_v47, %v1546_v40 }
 0x2f7   : > { %1555 = vpow2.f32 %v869_v48  ;;  %v850_v51 = vsub.f32 %v1918_v9, %v826_v49 }
 0x2f8   : > { %1415 = vmatmul.mubr.bf16.vlgmr.msra.gmra.mrb[12].mxu0 %v924_v50  ;;  %v838_v60 = vpop.xlane.xlu0 %837 }
 0x2f9   : > { %v873_v52 = vmul.f32 1.442695, %v850_v51  ;;  %v856_v4 = vsub.f32 %v1922_v11, %v838_v60 }
 0x2fa   : > { %v832_v53 = vpop.xlane.xlu1 %831 }
 0x2fb   : > { %1557 = vpow2.f32 %v873_v52  ;;  %v853_v55 = vsub.f32 %v1925_v12, %v832_v53  ;;  %v885_v10 = vmul.f32 1.442695, %v856_v4 }
 0x2fc   : > { %v842_v7 = vpop.xlane.xlu0 %841 }
 0x2fd   : > { %v1552_v54 = vpop.eup %1551  ;;  %v879_v62 = vmul.f32 1.442695, %v853_v55  ;;  %v858_v12 = vsub.f32 %v1929_v16, %v842_v7 }
 0x2fe   : > { %v828_v56 = vpop.xlane.xlu1 %827  ;;  %899 = vadd.xlane.f32.xlu1 %v1552_v54  ;;  %v1554_v58 = vpop.eup %1553 }
 0x2ff   : > { %v851_v57 = vsub.f32 %v1934_v18, %v828_v56  ;;  %v889_v11 = vmul.f32 1.442695, %v858_v12 }
 0x301   : > { %v1556_v59 = vpop.eup %1555  ;;  %v875_v61 = vmul.f32 1.442695, %v851_v57 }
 0x302   : > { %v830_v63 = vpop.xlane.xlu1 %829  ;;  %903 = vadd.xlane.f32.xlu1 %v1554_v58  ;;  %901 = vadd.xlane.f32.xlu0 %v1556_v59  ;;  %v925_v0 = vpack.c.bf16 %v1556_v59, %v1552_v54 }
 0x303   : > { %1559 = vpow2.f32 %v875_v61  ;;  %v852_v1 = vsub.f32 %v1938_v19, %v830_v63 }
 0x304   : > { %1418 = vmatprep.mubr.bf16.mxu0 %v925_v0  ;;  %1561 = vpow2.f32 %v879_v62 }
 0x305   : > { %v1558_v2 = vpop.eup %1557  ;;  %v877_v3 = vmul.f32 1.442695, %v852_v1 }
 0x306   : > { %v834_v5 = vpop.xlane.xlu1 %833  ;;  %905 = vadd.xlane.f32.xlu0 %v1558_v2  ;;  %v926_v6 = vpack.c.bf16 %v1558_v2, %v1554_v58 }
 0x307   : > { %1563 = vpow2.f32 %v877_v3  ;;  %v854_v8 = vsub.f32 %v1942_v20, %v834_v5 }
 0x308   : > { %1419 = vmatmul.mubr.bf16.gmra.mrb[16].mxu0 %v926_v6 }
 0x309   : > { %v881_v9 = vmul.f32 1.442695, %v854_v8 }
 0x30a   : > { %v836_v13 = vpop.xlane.xlu1 %835 }
 0x30b   : > { %1565 = vpow2.f32 %v881_v9  ;;  %v855_v15 = vsub.f32 %v1946_v21, %v836_v13 }
 0x30c   : > { %1567 = vpow2.f32 %v885_v10 }
 0x30d   : > { %v1560_v17 = vpop.eup %1559  ;;  %v883_v18 = vmul.f32 1.442695, %v855_v15 }
 0x30e   : > { %907 = vadd.xlane.f32.xlu1 %v1560_v17  ;;  %v840_v19 = vpop.xlane.xlu1 %839  ;;  %v1562_v24 = vpop.eup %1561 }
 0x30f   : > { %1569 = vpow2.f32 %v883_v18  ;;  %v857_v23 = vsub.f32 %v1950_v22, %v840_v19 }
 0x310   : > { %1571 = vpow2.f32 %v889_v11 }
 0x311   : > { %v1564_v20 = vpop.eup %1563  ;;  %v887_v25 = vmul.f32 1.442695, %v857_v23 }
 0x312   : > { %911 = vadd.xlane.f32.xlu1 %v1562_v24  ;;  %909 = vadd.xlane.f32.xlu0 %v1564_v20  ;;  %v927_v16 = vpack.c.bf16 %v1564_v20, %v1560_v17 }
 0x313   : > { %1573 = vpow2.f32 %v887_v25 }
 0x314   : > { %1422 = vmatprep.mubr.bf16.mxu0 %v927_v16 }
 0x315   : > { %v1566_v26 = vpop.eup %1565 }
 0x316   : > { %913 = vadd.xlane.f32.xlu0 %v1566_v26  ;;  %v928_v21 = vpack.c.bf16 %v1566_v26, %v1562_v24  ;;  %v1568_v27 = vpop.eup %1567 }
 0x318   : > { %1423 = vmatmul.mubr.bf16.gmra.mrb[20].mxu0 %v928_v21 }
 0x319   : > { %v1570_v28 = vpop.eup %1569 }
 0x31a   : > { %915 = vadd.xlane.f32.xlu1 %v1570_v28  ;;  %917 = vadd.xlane.f32.xlu0 %v1568_v27  ;;  %v929_v29 = vpack.c.bf16 %v1568_v27, %v1570_v28  ;;  %v1572_v30 = vpop.eup %1571 }
 0x31c   : > { %1426 = vmatprep.mubr.bf16.mxu0 %v929_v29 }
 0x31d   : > { %v1574_v22 = vpop.eup %1573 }
 0x31e   : > { %919 = vadd.xlane.f32.xlu1 %v1574_v22  ;;  %921 = vadd.xlane.f32.xlu0 %v1572_v30  ;;  %v930_v31 = vpack.c.bf16 %v1572_v30, %v1574_v22 }
 0x320   : > { %1427 = vmatmul.mubr.bf16.gmra.mrb[24].mxu0 %v930_v31 }
 0x37b   : > { %v892_v33 = vpop.xlane.xlu1 %891 }
 0x37c   : > { %1575 = vrcp.f32 %v892_v33 }
 0x37f   : > { %v894_v34 = vpop.xlane.xlu0 %893  ;;  %v896_v35 = vpop.xlane.xlu1 %895 }
 0x380   : > { %1577 = vrcp.f32 %v896_v35 }
 0x383   : > { %v898_v36 = vpop.xlane.xlu0 %897 }
 0x384   : > { %1579 = vrcp.f32 %v898_v36 }
 0x385   : > { %1581 = vrcp.f32 %v894_v34 }
 0x386   : > { %v1576_v39 = vpop.eup %1575 }
 0x38a   : > { %v1578_v41 = vpop.eup %1577 }
 0x38b   : > { %v900_v37 = vpop.xlane.xlu1 %899 }
 0x38c   : > { %1583 = vrcp.f32 %v900_v37 }
 0x38e   : > { %v1580_v43 = vpop.eup %1579 }
 0x38f   : > { %v902_v38 = vpop.xlane.xlu0 %901  ;;  %v1582_v45 = vpop.eup %1581 }
 0x390   : > { %v904_v49 = vpop.xlane.xlu1 %903 }
 0x391   : > { %1585 = vrcp.f32 %v904_v49 }
 0x393   : > { %v906_v52 = vpop.xlane.xlu0 %905 }
 0x394   : > { %1587 = vrcp.f32 %v906_v52 }
 0x395   : > { %1589 = vrcp.f32 %v902_v38 }
 0x396   : > { %v1584_v58 = vpop.eup %1583 }
 0x39b   : > { %v908_v57 = vpop.xlane.xlu1 %907  ;;  %v1586_v61 = vpop.eup %1585 }
 0x39c   : > { %1591 = vrcp.f32 %v908_v57  ;;  %v1722_v57 = vmov (!%p1316_p5), 0  }
 0x39d   : > { %1607 = vset.pattern.permute.xlu0 (!%p1316_p5), %v1722_v57 }
 0x39e   : > { %v1588_v0 = vpop.eup %1587 }
 0x39f   : > { %v910_v56 = vpop.xlane.xlu0 %909  ;;  %v912_v1 = vpop.xlane.xlu1 %911 }
 0x3a0   : > { %v1590_v3 = vpop.eup %1589  ;;  %1593 = vrcp.f32 %v912_v1 }
 0x3a3   : > { %v914_v62 = vpop.xlane.xlu0 %913 }
 0x3a4   : > { %1595 = vrcp.f32 %v914_v62 }
 0x3a5   : > { %1597 = vrcp.f32 %v910_v56 }
 0x3a6   : > { %v1592_v11 = vpop.eup %1591 }
 0x3a7   : > { %v916_v10 = vpop.xlane.xlu1 %915  ;;  %v918_v13 = vpop.xlane.xlu0 %917 }
 0x3a8   : > { %1599 = vrcp.f32 %v916_v10 }
 0x3aa   : > { %v1594_v24 = vpop.eup %1593 }
 0x3ab   : > { %v920_v17 = vpop.xlane.xlu1 %919  ;;  %v922_v18 = vpop.xlane.xlu0 %921 }
 0x3ac   : > { %1601 = vrcp.f32 %v920_v17 }
 0x3ad   : > { %1603 = vrcp.f32 %v922_v18 }
 0x3ae   : > { %1605 = vrcp.f32 %v918_v13  ;;  %v1596_v25 = vpop.eup %1595 }
 0x3af   : > { %v1598_v26 = vpop.eup %1597 }
 0x3b2   : > { %v1600_v33 = vpop.eup %1599 }
 0x3b6   : > { %v1602_v36 = vpop.eup %1601 }
 0x3b7   : > { %v1604_v38 = vpop.eup %1603 }
 0x3cb   : > { %v1416_v40 = vpop.f32.mrb[12].mxu0 }
 0x3cc   : > { %v967_v42 = vpop.f32.mrb[13].mxu0  ;;  %v1048_v46 = vmul.f32 %v1578_v41, %v1416_v40  ;;  %v1606_v40 = vpop.eup %1605 }
 0x3cd   : > { %v1417_v44 = vpop.f32.mrb[14].mxu0  ;;  %v1046_v50 = vmul.f32 %v1576_v39, %v967_v42 }
 0x3ce   : > { %v1049_v47 = vmul.f32 %v1580_v43, %v1417_v44  ;;  %v970_v48 = vpop.f32.mrb[15].mxu0 }
 0x3cf   : > { %v1047_v51 = vmul.f32 %v1582_v45, %v970_v48 }
 0x3d0   : > { %v1065_v53 = vpack.c.bf16 %v1049_v47, %v1048_v46 }
 0x3d1   : > { %v1064_v54 = vpack.c.bf16 %v1047_v51, %v1046_v50  ;;  %v1062_v51 = vld [vmem:[%s329_s14] sm:$0xf] }
 0x3d2   : > { %v1079_v60 = vsel %vm670_vm2, %v1065_v53, 0  ;;  %v1063_v52 = vpack.c.bf16 %v1062_v51, %v1062_v51 }
 0x3d3   : > { %v1076_v55 = vsel %vm670_vm2, %v1064_v54, 0 }
 0x3d4   : > { %1431 = vmatpush3.bf16.xpose.msra.mxu1 %v1076_v55 }
 0x3d5   : > { %1432 = vmatprep.subr.bf16.mxu1 %v1720_v32 }
 0x3db   : > { %v1420_v59 = vpop.f32.mrb[16].mxu0 }
 0x3dc   : > { %v983_v63 = vpop.f32.mrb[17].mxu0  ;;  %1433 = vmatpush3.bf16.xpose.msra.mxu1 %v1079_v60  ;;  %v1052_v4 = vmul.f32 %v1586_v61, %v1420_v59 }
 0x3dd   : > { %v1421_v2 = vpop.f32.mrb[18].mxu0  ;;  %1434 = vmatprep.subr.bf16.mxu1 %v1720_v32  ;;  %v1050_v7 = vmul.f32 %v1584_v58, %v983_v63 }
 0x3de   : > { %v1053_v5 = vmul.f32 %v1588_v0, %v1421_v2  ;;  %v986_v6 = vpop.f32.mrb[19].mxu0 }
 0x3df   : > { %v1051_v8 = vmul.f32 %v1590_v3, %v986_v6 }
 0x3e0   : > { %v1067_v9 = vpack.c.bf16 %v1053_v5, %v1052_v4 }
 0x3e1   : > { %v1066_v12 = vpack.c.bf16 %v1051_v8, %v1050_v7 }
 0x3e2   : > { %v1085_v23 = vsel %vm670_vm2, %v1067_v9, 0 }
 0x3e3   : > { %v1082_v15 = vsel %vm670_vm2, %v1066_v12, 0 }
 0x3e4   : > { %1435 = vmatpush3.bf16.xpose.msra.mxu1 %v1082_v15 }
 0x3e5   : > { %1436 = vmatprep.subr.bf16.mxu1 %v1720_v32 }
 0x3eb   : > { %v1424_v19 = vpop.f32.mrb[20].mxu0 }
 0x3ec   : > { %v999_v20 = vpop.f32.mrb[21].mxu0  ;;  %1437 = vmatpush3.bf16.xpose.msra.mxu1 %v1085_v23  ;;  %v1056_v21 = vmul.f32 %v1594_v24, %v1424_v19 }
 0x3ed   : > { %v1425_v16 = vpop.f32.mrb[22].mxu0  ;;  %1438 = vmatprep.subr.bf16.mxu1 %v1720_v32  ;;  %v1054_v29 = vmul.f32 %v1592_v11, %v999_v20 }
 0x3ee   : > { %v1057_v27 = vmul.f32 %v1596_v25, %v1425_v16  ;;  %v1002_v28 = vpop.f32.mrb[23].mxu0 }
 0x3ef   : > { %v1055_v30 = vmul.f32 %v1598_v26, %v1002_v28 }
 0x3f0   : > { %v1069_v22 = vpack.c.bf16 %v1057_v27, %v1056_v21 }
 0x3f1   : > { %v1068_v31 = vpack.c.bf16 %v1055_v30, %v1054_v29 }
 0x3f2   : > { %v1091_v48 = vsel %vm670_vm2, %v1069_v22, 0 }
 0x3f3   : > { %v1428_v34 = vpop.f32.mrb[24].mxu0  ;;  %v1088_v35 = vsel %vm670_vm2, %v1068_v31, 0 }
 0x3f4   : > { %v1015_v37 = vpop.f32.mrb[25].mxu0  ;;  %1439 = vmatpush3.bf16.xpose.msra.mxu1 %v1088_v35  ;;  %v1060_v41 = vmul.f32 %v1602_v36, %v1428_v34 }
 0x3f5   : > { %v1429_v39 = vpop.f32.mrb[26].mxu0  ;;  %1440 = vmatprep.subr.bf16.mxu1 %v1720_v32  ;;  %v1058_v44 = vmul.f32 %v1600_v33, %v1015_v37 }
 0x3f6   : > { %v1061_v42 = vmul.f32 %v1604_v38, %v1429_v39  ;;  %v1018_v43 = vpop.f32.mrb[27].mxu0 }
 0x3f7   : > { %v1059_v45 = vmul.f32 %v1606_v40, %v1018_v43 }
 0x3f8   : > { %v1071_v46 = vpack.c.bf16 %v1061_v42, %v1060_v41 }
 0x3f9   : > { %v1070_v47 = vpack.c.bf16 %v1059_v45, %v1058_v44 }
 0x3fa   : > { %v1097_v50 = vsel %vm670_vm2, %v1071_v46, 0 }
 0x3fb   : > { %v1094_v49 = vsel %vm670_vm2, %v1070_v47, 0 }
 0x3fc   : > { %1441 = vmatpush3.bf16.xpose.msra.mxu1 %v1091_v48 }
 0x3fd   : > { %1442 = vmatprep.subr.bf16.mxu1 %v1720_v32 }
 0x404   : > { %1443 = vmatpush3.bf16.xpose.msra.mxu1 %v1094_v49 }
 0x405   : > { %1444 = vmatprep.subr.bf16.mxu1 %v1720_v32  ;;  %v1143_v32 = vld [vmem:[%s2061_s3] sm:$0xf] (!%p1316_p5) }
 0x406   : > { %1146 = vperm.xlu0 (!%p1316_p5), %1607, %v1143_v32  }
 0x40c   : > { %1445 = vmatpush3.bf16.xpose.msra.mxu1 %v1097_v50 }
 0x413   : > { %1447 = vmatmul.mubr.msk.bf16.vlgmr.msra.gmra.mrb[16].mxu1 %vm670_vm2, %v1063_v52 }
 0x485   : > { %v1147_v58 = vpop.permute.xlu0 (!%p1316_p5), %1146 }
 0x486   : > { %v1149_v59 = vadd.f32 (!%p1316_p5), %v1147_v58, %v1864_v14 }
 0x488   : > { %1150 = vst [vmem:[%s321_s25] sm:$0xf] (!%p1316_p5), %v1149_v59 }
 0x4e3   : > { %1142 = sbr.rel (%p1316_p5) target bundleno = 1258 (0x4ea), region = 78 }
 0x4e6   : > { %v1133_v53 = vpop.f32.mrb[16].mxu1 }
 0x4e7   : > { %v1448_v54 = vpop.f32.mrb[17].mxu1 }
 0x4e8   : > { %v1136_v55 = vpop.f32.mrb[18].mxu1 }
 0x4e9   : > { %v1449_v56 = vpop.f32.mrb[19].mxu1 }
 0x4ea PF: > { %v1151_v60 = vld [vmem:[%s321_s25] sm:$0xf]  ;;  %s1318_s6 = sshll.u32 %s1706_s21, 6  ;;  %s1169_s8 = sshll.u32 %s321_s25, 4  ;;  %s1999_s8 = int_to_ptr.vmem [resolvable:$true] %s1169_s8 }
 0x4eb   : > { %v1152_v61 = vadd.f32 %v1151_v60, %v1133_v53  ;;  %s1997_s18 = scalar_lea.hbm %s2062_s4, %s1318_s6  ;;  %s1155_s12 = scalar_lea.sflag [#allocation4], %s319_s5 }
 0x4ec   : > { %s1608_s13 = scalar_lea.vmem %s1999_s8, 64  ;;  %s1723_s21 = smov [#allocation3]  }
 0x4ed   : > { %1153 = vst [vmem:[%s321_s25] sm:$0xf] %v1152_v61  ;;  %p1609_p6 = scmp.ne.s32.totalorder %s1999_s8, %s1608_s13  ;;  %s1612_s14 = sshll.u32 %s1723_s21, 4  ;;  %s1613_s14 = int_to_ptr.vmem [resolvable:$false] %s1612_s14 }
 0x4ee   : > { %s1614_s29 = scalar_lea.vmem %s1613_s14, 128  ;;  %p1615_p9 = scmp.lt.s32.totalorder %s1999_s8, %s1613_s14 }
 0x4ef   : > { %p1610_p7 = pnand %p1609_p6, %p1828_p10  ;;  %p1616_p11 = scmp.lt.s32.totalorder %s1614_s29, %s1608_s13 }
 0x4f1   : > { %p1611_p8 = pneg %p1610_p7  ;;  %p1617_p13 = por %p1616_p11, %p1615_p9 }
 0x4f3   : > { %p1618_p0 = pnand %p1617_p13, %p1611_p8 }
 0x4f5   : > { %1621 = shalt.err (!%p1618_p0)
}
 0x4f6   : > { %s1622_s5 = scalar_lea.hbm %s1997_s18, 64  ;;  %s1626_s6 = scalar_lea.hbm %s2062_s4, 128 }
 0x4f7   : > { %p1623_p1 = scmp.ne.s32.totalorder %s1997_s18, %s1622_s5  ;;  %p1627_p4 = scmp.lt.u32.totalorder %s1997_s18, %s2062_s4 }
 0x4f8   : > { %p1628_p5 = scmp.lt.u32.totalorder %s1626_s6, %s1622_s5  ;;  %p1630_p7 = scmp.lt.u32.totalorder %s1622_s5, %s1997_s18 }
 0x4f9   : > { %p1624_p2 = pnand %p1623_p1, %p1828_p10 }
 0x4fa   : > { %p1629_p6 = por %p1628_p5, %p1627_p4 }
 0x4fb   : > { %p1625_p3 = pneg %p1624_p2 }
 0x4fc   : > { %p1631_p8 = por %p1630_p7, %p1629_p6 }
 0x4fe   : > { %p1632_p9 = pnand %p1631_p8, %p1625_p3 }
 0x500   : > { %1635 = shalt.err (!%p1632_p9)
}
 0x501   : > { %1452 = dma.vmem_to_hbm [thread:$0]  (%p1828_p10), %s1999_s8, 64, %s1997_s18, %s1155_s12  }
 0x502 PF: > { %p1458_p11 = scmp.ge.s32.totalorder %s1718_s24, 2  ;;  %s1181_s13 = sand.u32 1, %s1682_s15  }
 0x503   : > { %s1182_s21 = scalar_lea.sflag [#allocation4], %s1181_s13 }
 0x504   : > { %p1455_p13 = pnand %p1458_p11, %p1835_p12 }
 0x506   : > { %1677 = dma.done.wait (!%p1455_p13), %s1182_s21, 64  }
 0x507   : > { %1679 = vsyncadd (!%p1455_p13), %s1182_s21, 4294967232  ;;  %s17_s24 = sadd.s32 1, %s1718_s24   ;;  %s2066_s15 = smov %s1686_s16 }
 0x508   : > { %p14_p0 = scmp.ge.s32.totalorder %s17_s24, 10   ;;  %s2067_s16 = smov %s1690_s17 }
 0x509   : > { %s2068_s17 = smov %s1833_s10  ;;  %s2069_s18 = smov %s1698_s19 }
 0x50a   : > { %s2070_s19 = smov %s1822_s7  ;;  %s2071_s20 = smov %s1710_s22 }
 0x50b   : > { %s2072_s21 = smov %s1714_s23  ;;  %s2073_s22 = smov %s2076_s27 }
 0x50c   : > { %s2074_s23 = smov %s2080_s28  ;;  %16 = sbr.rel (!%p14_p0) target bundleno = 6 (0x6), region = 127 }
 0x513   :  { %1187 = vsyncpa [#allocation4], 1 }
 0x514   :  { %1189 = vsyncpa [#allocation4 + $0x1], 1 }

</bundles_post_ra>
